<compile_context>
chip_gen: v7x
topology: tpu7x:2x2x1
jax: 0.10.0
libtpu: 0.0.40
codegen_flags: <defaults>
</compile_context>

<pallas_src>
import jax
import jax.numpy as jnp
from jax.experimental import pallas as pl
from jax.experimental.pallas import tpu as pltpu

H = 768            # hidden size fixed by nn.LayerNorm(768)
NUM_LABELS = 4     # opt.num_labels (synthetic choice)
LN_EPS = 1e-5      # PyTorch nn.LayerNorm default eps
TILE_B_MAX = 512   # batch tile cap (multiple of 256 for v6e/v7x MXU fill)


def _round_up(x, m):
    return (x + m - 1) // m * m


def _head_kernel(cls_ref, gamma_ref, beta_ref, w_ref, b_ref, out_ref):
    # TODO(synk): Dropout(0.1) is identity at inference; training-mode dropout not modeled.
    x = cls_ref[...].astype(jnp.float32)                        # [TILE_B, H]

    # LayerNorm(768), one-pass stats: both reductions issued before any
    # dependent elementwise work so the XLU reductions overlap.
    s = jnp.sum(x, axis=-1, keepdims=True)
    sq = jnp.sum(x * x, axis=-1, keepdims=True)
    mean = s * (1.0 / H)
    var = sq * (1.0 / H) - mean * mean
    inv = jax.lax.rsqrt(var + LN_EPS)
    xn = (x - mean) * inv * gamma_ref[...] + beta_ref[...]       # [TILE_B, H]

    # Linear(768 -> num_labels): bf16 MXU inputs (weight pre-cast in the
    # wrapper, resident block), f32 accumulate.
    logits = jnp.dot(xn.astype(jnp.bfloat16), w_ref[...],
                     preferred_element_type=jnp.float32)         # [TILE_B, NUM_LABELS]
    logits = logits + b_ref[...]

    # Softmax over labels (dim=1); reciprocal goes to the EUP slot.
    m = jnp.max(logits, axis=-1, keepdims=True)
    e = jnp.exp(logits - m)
    denom = jnp.sum(e, axis=-1, keepdims=True)
    out_ref[...] = (e * pl.reciprocal(denom, approx=True)).astype(out_ref.dtype)


@jax.jit
def bert_head(hidden, gamma, beta, w, b):
    """hidden: [B, S, H] (bf16 or f32); gamma/beta: [H]; w: [H, NUM_LABELS]; b: [NUM_LABELS]."""
    B, S, Hh = hidden.shape
    assert Hh == H

    # CLS extraction fused into the BlockSpec: view (B, S, H) as (B, S*H)
    # (free contiguous reshape); a (tile_b, H) block at column-block 0 reads
    # exactly the seq-position-0 hidden vectors.  No padding / no copies.
    hidden2d = hidden.reshape(B, S * H)

    # >=2 grid steps for moderate B so both v7x TensorCores get work; batch
    # tiles are multiples of 8 (sublanes), capped at TILE_B_MAX.
    tile_b = min(TILE_B_MAX, max(8, _round_up(pl.cdiv(B, 2), 8)))
    num_tiles = pl.cdiv(B, tile_b)

    gamma2 = gamma.reshape(1, H).astype(jnp.float32)
    beta2 = beta.reshape(1, H).astype(jnp.float32)
    w2 = w.astype(jnp.bfloat16)                    # pre-cast once; resident in VMEM
    b2 = b.reshape(1, NUM_LABELS).astype(jnp.float32)

    return pl.pallas_call(
        _head_kernel,
        out_shape=jax.ShapeDtypeStruct((B, NUM_LABELS), jnp.float32),
        grid=(num_tiles,),
        in_specs=[
            # CLS rows only; ragged last tile is fine (rows are independent,
            # partial output stores are masked).  If the strided input DMA is
            # exposed on v5e, add pipeline_mode=pl.Buffered(3) here.
            pl.BlockSpec((tile_b, H), lambda i: (i, 0)),
            pl.BlockSpec((1, H), lambda i: (0, 0)),              # gamma (resident)
            pl.BlockSpec((1, H), lambda i: (0, 0)),              # beta  (resident)
            pl.BlockSpec((H, NUM_LABELS), lambda i: (0, 0)),     # weight (resident, bf16)
            pl.BlockSpec((1, NUM_LABELS), lambda i: (0, 0)),     # bias  (resident)
        ],
        out_specs=pl.BlockSpec((tile_b, NUM_LABELS), lambda i: (i, 0)),
        compiler_params=pltpu.CompilerParams(
            dimension_semantics=("parallel",)),                  # v7x: shard tiles over 2 TCs
    )(hidden2d, gamma2, beta2, w2, b2)


def fake_pretrained_model(input_ids, attention_mask, token_type_ids, params):
    """Deterministic stand-in for the pretrained BERT encoder (plain-JAX glue).

    TODO(synk): full pretrained transformer encoder not reproducible without a
    checkpoint; replaced by an embedding-sum stub producing [B, S, H] hidden states.
    Emits bf16 (TPU-typical encoder activation dtype) so the head kernel's
    CLS-row DMA is half-width.
    """
    word_emb, pos_emb, type_emb = params
    _, S = input_ids.shape
    h = word_emb[input_ids]                       # [B, S, H]
    h = h + pos_emb[:S][None, :, :]
    h = h + type_emb[token_type_ids]
    h = h * attention_mask[..., None].astype(h.dtype)
    return h.astype(jnp.bfloat16)


if __name__ == "__main__":
    key = jax.random.PRNGKey(0)
    k1, k2, k3, k4, k5, k6, k7 = jax.random.split(key, 7)

    B, S, VOCAB = 2, 8, 64

    # Stub "pretrained model" parameters.
    word_emb = 0.02 * jax.random.normal(k1, (VOCAB, H), jnp.float32)
    pos_emb = 0.02 * jax.random.normal(k2, (S, H), jnp.float32)
    type_emb = 0.02 * jax.random.normal(k3, (2, H), jnp.float32)

    # Head parameters (LayerNorm(768) + Linear(768, num_labels)).
    gamma = jnp.ones((H,), jnp.float32) + 0.01 * jax.random.normal(k4, (H,), jnp.float32)
    beta = 0.01 * jax.random.normal(k5, (H,), jnp.float32)
    w_fc = 0.02 * jax.random.normal(k6, (H, NUM_LABELS), jnp.float32)
    b_fc = 0.01 * jax.random.normal(k7, (NUM_LABELS,), jnp.float32)

    # Inputs matching the PyTorch forward signature.
    input_ids = jax.random.randint(jax.random.PRNGKey(1), (B, S), 0, VOCAB)
    attention_mask = jnp.ones((B, S), jnp.int32)
    token_type_ids = jnp.zeros((B, S), jnp.int32)

    hidden = fake_pretrained_model(input_ids, attention_mask, token_type_ids,
                                   (word_emb, pos_emb, type_emb))  # [B, S, H] bf16

    probs = bert_head(hidden, gamma, beta, w_fc, b_fc)
    probs = jax.block_until_ready(probs)

    # Reference check in plain f32 JAX (same bf16 hidden, upcast).
    cls = hidden[:, 0].astype(jnp.float32)
    mean = jnp.mean(cls, axis=-1, keepdims=True)
    var = jnp.mean((cls - mean) ** 2, axis=-1, keepdims=True)
    xn = (cls - mean) / jnp.sqrt(var + LN_EPS) * gamma + beta
    ref = jax.nn.softmax(xn @ w_fc + b_fc, axis=1)

    assert probs.shape == (B, NUM_LABELS)
    # bf16 MXU inputs + approx reciprocal => small deviation from f32 reference.
    assert jnp.allclose(probs, ref, atol=1e-2, rtol=0.0), (probs, ref)
    assert jnp.allclose(jnp.sum(probs, axis=1), jnp.ones((B,), jnp.float32), atol=1e-2)

    print("KERNEL_OK")
</pallas_src>

<mosaic_0001>
module attributes {stable_mosaic.version = 11 : i64} {
  func.func @_head_kernel(%arg0: i32, %arg1: memref<8x768xbf16, #tpu.memory_space<vmem>>, %arg2: memref<1x768xf32, #tpu.memory_space<vmem>>, %arg3: memref<1x768xf32, #tpu.memory_space<vmem>>, %arg4: memref<768x4xbf16, #tpu.memory_space<vmem>>, %arg5: memref<1x4xf32, #tpu.memory_space<vmem>>, %arg6: memref<8x4xf32, #tpu.memory_space<vmem>>) attributes {dimension_semantics = [#tpu.dimension_semantics<parallel>], iteration_bounds = array<i64: 1>, scalar_prefetch = 0 : i64, scratch_operands = 0 : i64, tpu.core_type = #tpu.core_type<tc>, window_params = [{transform_indices = @transform_0, window_bounds = array<i64: 8, 768>}, {pipeline_mode = #tpu.pipeline_mode<synchronous>, transform_indices = @transform_1, window_bounds = array<i64: 1, 768>}, {pipeline_mode = #tpu.pipeline_mode<synchronous>, transform_indices = @transform_2, window_bounds = array<i64: 1, 768>}, {pipeline_mode = #tpu.pipeline_mode<synchronous>, transform_indices = @transform_3, window_bounds = array<i64: 768, 4>}, {pipeline_mode = #tpu.pipeline_mode<synchronous>, transform_indices = @transform_4, window_bounds = array<i64: 1, 4>}, {transform_indices = @transform_5, window_bounds = array<i64: 8, 4>}]} {
    %c0 = arith.constant 0 : index
    %c0_0 = arith.constant 0 : index
    %0 = vector.load %arg1[%c0, %c0_0] : memref<8x768xbf16, #tpu.memory_space<vmem>>, vector<8x768xbf16>
    %1 = arith.extf %0 : vector<8x768xbf16> to vector<8x768xf32>
    %cst = arith.constant dense<0.000000e+00> : vector<8xf32>
    %2 = vector.multi_reduction <add>, %1, %cst [1] : vector<8x768xf32> to vector<8xf32>
    %3 = vector.shape_cast %2 : vector<8xf32> to vector<8x1xf32>
    %4 = arith.mulf %1, %1 : vector<8x768xf32>
    %cst_1 = arith.constant dense<0.000000e+00> : vector<8xf32>
    %5 = vector.multi_reduction <add>, %4, %cst_1 [1] : vector<8x768xf32> to vector<8xf32>
    %6 = vector.shape_cast %5 : vector<8xf32> to vector<8x1xf32>
    %cst_2 = arith.constant 0.00130208337 : f32
    %7 = vector.broadcast %cst_2 : f32 to vector<8x1xf32>
    %8 = arith.mulf %3, %7 : vector<8x1xf32>
    %cst_3 = arith.constant 0.00130208337 : f32
    %9 = vector.broadcast %cst_3 : f32 to vector<8x1xf32>
    %10 = arith.mulf %6, %9 : vector<8x1xf32>
    %11 = arith.mulf %8, %8 : vector<8x1xf32>
    %12 = arith.subf %10, %11 : vector<8x1xf32>
    %cst_4 = arith.constant 9.99999974E-6 : f32
    %13 = vector.broadcast %cst_4 : f32 to vector<8x1xf32>
    %14 = arith.addf %12, %13 : vector<8x1xf32>
    %15 = math.rsqrt %14 : vector<8x1xf32>
    %16 = vector.broadcast %8 : vector<8x1xf32> to vector<8x768xf32>
    %17 = arith.subf %1, %16 : vector<8x768xf32>
    %18 = vector.broadcast %15 : vector<8x1xf32> to vector<8x768xf32>
    %19 = arith.mulf %17, %18 : vector<8x768xf32>
    %c0_5 = arith.constant 0 : index
    %c0_6 = arith.constant 0 : index
    %20 = vector.load %arg2[%c0_5, %c0_6] : memref<1x768xf32, #tpu.memory_space<vmem>>, vector<1x768xf32>
    %21 = vector.broadcast %20 : vector<1x768xf32> to vector<8x768xf32>
    %22 = arith.mulf %19, %21 : vector<8x768xf32>
    %c0_7 = arith.constant 0 : index
    %c0_8 = arith.constant 0 : index
    %23 = vector.load %arg3[%c0_7, %c0_8] : memref<1x768xf32, #tpu.memory_space<vmem>>, vector<1x768xf32>
    %24 = vector.broadcast %23 : vector<1x768xf32> to vector<8x768xf32>
    %25 = arith.addf %22, %24 : vector<8x768xf32>
    %26 = arith.truncf %25 : vector<8x768xf32> to vector<8x768xbf16>
    %c0_9 = arith.constant 0 : index
    %c0_10 = arith.constant 0 : index
    %27 = vector.load %arg4[%c0_9, %c0_10] : memref<768x4xbf16, #tpu.memory_space<vmem>>, vector<768x4xbf16>
    %cst_11 = arith.constant dense<0.000000e+00> : vector<8x4xf32>
    %28 = tpu.matmul %26, %27, %cst_11 {dimension_numbers = #tpu.dot_dimension_numbers<[1], [0], [0], [1], [0, 0, 1, 1], [], []>} : vector<8x768xbf16>, vector<768x4xbf16>, vector<8x4xf32> -> vector<8x4xf32>
    %c0_12 = arith.constant 0 : index
    %c0_13 = arith.constant 0 : index
    %29 = vector.load %arg5[%c0_12, %c0_13] : memref<1x4xf32, #tpu.memory_space<vmem>>, vector<1x4xf32>
    %30 = vector.broadcast %29 : vector<1x4xf32> to vector<8x4xf32>
    %31 = arith.addf %28, %30 : vector<8x4xf32>
    %cst_14 = arith.constant dense<0xFF800000> : vector<8xf32>
    %32 = vector.multi_reduction <maximumf>, %31, %cst_14 [1] : vector<8x4xf32> to vector<8xf32>
    %33 = vector.shape_cast %32 : vector<8xf32> to vector<8x1xf32>
    %34 = vector.broadcast %33 : vector<8x1xf32> to vector<8x4xf32>
    %35 = arith.subf %31, %34 : vector<8x4xf32>
    %36 = math.exp %35 : vector<8x4xf32>
    %cst_15 = arith.constant dense<0.000000e+00> : vector<8xf32>
    %37 = vector.multi_reduction <add>, %36, %cst_15 [1] : vector<8x4xf32> to vector<8xf32>
    %38 = vector.shape_cast %37 : vector<8xf32> to vector<8x1xf32>
    %39 = tpu.reciprocal %38 {approx = true} : vector<8x1xf32> -> vector<8x1xf32>
    %40 = vector.broadcast %39 : vector<8x1xf32> to vector<8x4xf32>
    %41 = arith.mulf %36, %40 : vector<8x4xf32>
    %c0_16 = arith.constant 0 : index
    %c0_17 = arith.constant 0 : index
    %42 = vector.load %arg6[%c0_16, %c0_17] : memref<8x4xf32, #tpu.memory_space<vmem>>, vector<8x4xf32>
    tpu.vector_store %arg6[%c0_16, %c0_17], %41 {strides = array<i32>} : memref<8x4xf32, #tpu.memory_space<vmem>>, vector<8x4xf32>,
    return
  }
  func.func @transform_0(%arg0: i32) -> (i32, i32) {
    %c0_i32 = arith.constant 0 : i32
    %c0_i32_0 = arith.constant 0 : i32
    return %arg0, %c0_i32 : i32, i32
  }
  func.func @transform_1(%arg0: i32) -> (i32, i32) {
    %c0_i32 = arith.constant 0 : i32
    %c0_i32_0 = arith.constant 0 : i32
    %c0_i32_1 = arith.constant 0 : i32
    return %c0_i32, %c0_i32_0 : i32, i32
  }
  func.func @transform_2(%arg0: i32) -> (i32, i32) {
    %c0_i32 = arith.constant 0 : i32
    %c0_i32_0 = arith.constant 0 : i32
    %c0_i32_1 = arith.constant 0 : i32
    return %c0_i32, %c0_i32_0 : i32, i32
  }
  func.func @transform_3(%arg0: i32) -> (i32, i32) {
    %c0_i32 = arith.constant 0 : i32
    %c0_i32_0 = arith.constant 0 : i32
    %c0_i32_1 = arith.constant 0 : i32
    return %c0_i32, %c0_i32_0 : i32, i32
  }
  func.func @transform_4(%arg0: i32) -> (i32, i32) {
    %c0_i32 = arith.constant 0 : i32
    %c0_i32_0 = arith.constant 0 : i32
    %c0_i32_1 = arith.constant 0 : i32
    return %c0_i32, %c0_i32_0 : i32, i32
  }
  func.func @transform_5(%arg0: i32) -> (i32, i32) {
    %c0_i32 = arith.constant 0 : i32
    %c0_i32_0 = arith.constant 0 : i32
    return %arg0, %c0_i32 : i32, i32
  }
}

</mosaic_0001>

<bundles_post_ra>
// kernel: bert_head.1
= control target key start
LH: loop header
LB: loop body
LE: loop exit
PB: predicated region body
PF: predicated region fallthrough
CT: control target
= control target key end

     0   :  { %v56_v1 = vld [vmem:[#allocation2 + $0x6] sm:$0x3f]  ;;  %v57_v2 = vld [vmem:[#allocation2 + $0xc] sm:$0x3f]  ;;  %v82_v3 = vlaneseq  ;;  %v58_v4 = vld [vmem:[#allocation2 + $0x12] sm:$0x3f]  ;;  %s1635_s0 = inlined_call_operand.vmem [shape: bf16[2,6144], index: 0, kind: input, shape index: {}]   ;;  %s1636_s1 = inlined_call_operand.vmem [shape: f32[1,768], index: 1, kind: input, shape index: {}]   ;;  %s1637_s2 = inlined_call_operand.vmem [shape: f32[1,768], index: 2, kind: input, shape index: {}]   ;;  %s1638_s3 = inlined_call_operand.vmem [shape: bf16[768,4], index: 3, kind: input, shape index: {}]   ;;  %s1639_s4 = inlined_call_operand.vmem [shape: f32[1,4], index: 4, kind: input, shape index: {}]   ;;  %s1640_s5 = inlined_call_operand.hbm [shape: f32[2,4], index: 5, kind: output, shape index: {}]  }
   0x1   :  { %v28_v0 = vld [vmem:[%s1635_s0] sm:$0x3f] }
   0x2   :  { %29 = vst [vmem:[#allocation2] sm:$0x3f] %v28_v0 }
   0x3   :  { %10 = vsyncpa [#allocation4], 0  ;;  %v1365_v5 = vunpack.c.l.bf16 %v57_v2  ;;  %v1367_v6 = vunpack.c.l.bf16 %v58_v4  ;;  %v1369_v7 = vshrl.u32 %v82_v3, 7  ;;  %v1324_v8 = vmov 1983009808  }
   0x4   :  { %v80_v9 = vunpack.c.l.s4 %v1324_v8  ;;  %v1371_v10 = vunpack.c.l.bf16 %v56_v1  ;;  %v1373_v11 = vunpack.c.h.bf16 %v57_v2  ;;  %v1375_v12 = vunpack.c.h.bf16 %v58_v4 }
   0x5   :  { %v77_v14 = vcombine.low %v1365_v5, %v1367_v6  ;;  %v78_v15 = vcombine.high %v1365_v5, %v1367_v6  ;;  %v146_v16 = vmul.f32 %v1365_v5, %v1365_v5  ;;  %v148_v17 = vmul.f32 %v1367_v6, %v1367_v6 }
   0x6   :  { %v81_v13 = vunpack.c.0.s8 %v80_v9  ;;  %v1385_v18 = vunpack.c.h.bf16 %v56_v1  ;;  %v144_v21 = vmul.f32 %v1371_v10, %v1371_v10  ;;  %v147_v22 = vmul.f32 %v1373_v11, %v1373_v11 }
   0x7   :  { %v149_v23 = vmul.f32 %v1375_v12, %v1375_v12  ;;  %v112_v26 = vcombine.low %v1373_v11, %v1375_v12  ;;  %v160_v30 = vcombine.low %v146_v16, %v148_v17  ;;  %v161_v31 = vcombine.high %v146_v16, %v148_v17  ;;  %v1247_v16 = vld [vmem:[%s1638_s3] sm:$0xff]  }
   0x8   :  { %v1388_v19 = vsub.s32 %v81_v13, %v1369_v7  ;;  %v145_v27 = vmul.f32 %v1385_v18, %v1385_v18  ;;  %v1248_v17 = vld [vmem:[%s1638_s3 + $0xc0] sm:$0xff]   ;;  %vm1090_vm0 = vcmask 31744  }
   0x9   :  { %v55_v20 = vld [vmem:[#allocation2] sm:$0x3f]  ;;  %v195_v37 = vcombine.low %v147_v22, %v149_v23  ;;  %1194 = vmatprep.subr.bf16.mxu1 %v1248_v17  ;;  %v1251_v22 = vld [vmem:[%s1638_s3 + $0x8] sm:$0xff]  }
   0xa   :  { %v1396_v24 = vunpack.c.l.bf16 %v55_v20  ;;  %v1398_v25 = vunpack.c.h.bf16 %v55_v20  ;;  %v99_v28 = vrot.slane %v77_v14, %v1388_v19  ;;  %v106_v29 = vrot.slane %v78_v15, %v1388_v19  ;;  %v1246_v15 = vld [vmem:[%s1638_s3 + $0x40] sm:$0xff]   ;;  %v1252_v23 = vld [vmem:[%s1638_s3 + $0xc8] sm:$0xff]  }
   0xb   :  { %v126_v40 = vrot.slane %v112_v26, %v1388_v19  ;;  %v182_v43 = vrot.slane %v160_v30, %v1388_v19  ;;  %v189_v44 = vrot.slane %v161_v31, %v1388_v19  ;;  %v209_v54 = vrot.slane %v195_v37, %v1388_v19  ;;  %1172 = vmatprep.subr.bf16.mxu0 %v1246_v15  ;;  %v1249_v20 = vld [vmem:[%s1638_s3 + $0x80] sm:$0xff]   ;;  %v1253_v26 = vld [vmem:[%s1638_s3 + $0x88] sm:$0xff]   ;;  %v1257_v30 = vld [vmem:[%s1638_s3 + $0x90] sm:$0xff]  }
   0xc   :  { %v75_v32 = vcombine.low %v1396_v24, %v1371_v10  ;;  %v76_v33 = vcombine.high %v1396_v24, %v1371_v10  ;;  %v111_v34 = vcombine.low %v1398_v25, %v1385_v18  ;;  %v142_v35 = vmul.f32 %v1396_v24, %v1396_v24  ;;  %1173 = vmatpush3.bf16.msra.mxu0 %v1247_v16  ;;  %v1258_v31 = vld [vmem:[%s1638_s3 + $0x58] sm:$0xff]   ;;  %v1263_v37 = vld [vmem:[%s1638_s3 + $0x20] sm:$0xff]  }
   0xd   :  { %v143_v36 = vmul.f32 %v1398_v25, %v1398_v25  ;;  %1195 = vmatpush3.bf16.msra.mxu1 %v1249_v20 }
   0xe   :  { %v85_v38 = vrot.slane %v75_v32, %v1388_v19  ;;  %v92_v39 = vrot.slane %v76_v33, %v1388_v19  ;;  %v158_v41 = vcombine.low %v142_v35, %v144_v21  ;;  %v159_v42 = vcombine.high %v142_v35, %v144_v21  ;;  %v1250_v21 = vld [vmem:[%s1638_s3 + $0x48] sm:$0xff]   ;;  %1196 = vmatprep.subr.bf16.mxu1 %v1252_v23  ;;  %v1260_v32 = vld [vmem:[%s1638_s3 + $0xd8] sm:$0xff]   ;;  %v1262_v35 = vld [vmem:[%s1638_s3 + $0x60] sm:$0xff]  }
   0xf   :  { %v194_v45 = vcombine.low %v143_v36, %v145_v27  ;;  %v119_v49 = vrot.slane %v111_v34, %v1388_v19  ;;  %1174 = vmatprep.subr.bf16.mxu0 %v1250_v21  ;;  %v1254_v27 = vld [vmem:[%s1638_s3 + $0x50] sm:$0xff]   ;;  %v1259_v33 = vld [vmem:[%s1638_s3 + $0x18] sm:$0xff]   ;;  %v1264_v36 = vld [vmem:[%s1638_s3 + $0xe0] sm:$0xff]  }
  0x10   :  { %v107_v46 = vcombine.low %v85_v38, %v99_v28  ;;  %v108_v47 = vcombine.high %v85_v38, %v99_v28  ;;  %v109_v48 = vcombine.low %v92_v39, %v106_v29  ;;  %v168_v50 = vrot.slane %v158_v41, %v1388_v19  ;;  %1175 = vmatpush3.bf16.msra.mxu0 %v1251_v22  ;;  %v1255_v28 = vld [vmem:[%s1638_s3 + $0x10] sm:$0xff]   ;;  %v1261_v34 = vld [vmem:[%s1638_s3 + $0x98] sm:$0xff]   ;;  %v1265_v38 = vld [vmem:[%s1638_s3 + $0xa0] sm:$0xff]  }
  0x11   :  { %v175_v51 = vrot.slane %v159_v42, %v1388_v19  ;;  %v110_v52 = vcombine.high %v92_v39, %v106_v29  ;;  %v202_v58 = vrot.slane %v194_v45, %v1388_v19  ;;  %v127_v59 = vcombine.low %v119_v49, %v126_v40  ;;  %v1256_v29 = vld [vmem:[%s1638_s3 + $0xd0] sm:$0xff]   ;;  %1197 = vmatpush3.bf16.msra.mxu1 %v1253_v26  ;;  %v1266_v39 = vld [vmem:[%s1638_s3 + $0x68] sm:$0xff]  }
  0x12   :  { %v135_v53 = vadd.f32 %v108_v47, %v107_v46  ;;  %v190_v55 = vcombine.low %v168_v50, %v182_v43  ;;  %v191_v56 = vcombine.high %v168_v50, %v182_v43  ;;  %v128_v63 = vcombine.high %v119_v49, %v126_v40  ;;  %1176 = vmatprep.subr.bf16.mxu0 %v1254_v27  ;;  %v1268_v40 = vld [vmem:[%s1638_s3 + $0xe8] sm:$0xff]   ;;  %v1270_v43 = vld [vmem:[%s1638_s3 + $0x70] sm:$0xff]   ;;  %v1274_v47 = vld [vmem:[%s1638_s3 + $0x78] sm:$0xff]  }
  0x13   :  { %v192_v57 = vcombine.low %v175_v51, %v189_v44  ;;  %v193_v61 = vcombine.high %v175_v51, %v189_v44  ;;  %v210_v1 = vcombine.low %v202_v58, %v209_v54  ;;  %v211_v4 = vcombine.high %v202_v58, %v209_v54  ;;  %1198 = vmatprep.subr.bf16.mxu1 %v1256_v29  ;;  %v1267_v41 = vld [vmem:[%s1638_s3 + $0x28] sm:$0xff]   ;;  %v1272_v44 = vld [vmem:[%s1638_s3 + $0xf0] sm:$0xff]   ;;  %v1275_v49 = vld [vmem:[%s1638_s3 + $0x38] sm:$0xff]  }
  0x14   :  { %v136_v60 = vadd.f32 %v135_v53, %v109_v48  ;;  %v218_v62 = vadd.f32 %v191_v56, %v190_v55  ;;  %1177 = vmatpush3.bf16.msra.mxu0 %v1255_v28  ;;  %v1269_v42 = vld [vmem:[%s1638_s3 + $0xa8] sm:$0xff]   ;;  %v1271_v45 = vld [vmem:[%s1638_s3 + $0x30] sm:$0xff]   ;;  %v1276_v48 = vld [vmem:[%s1638_s3 + $0xf8] sm:$0xff]   ;;  %v317_v56 = vsub.s32 0, %v1369_v7 }
  0x15   :  { %1199 = vmatpush3.bf16.msra.mxu1 %v1257_v30  ;;  %1178 = vmatprep.subr.bf16.mxu0 %v1258_v31  ;;  %v1273_v46 = vld [vmem:[%s1638_s3 + $0xb0] sm:$0xff]   ;;  %v1277_v50 = vld [vmem:[%s1638_s3 + $0xb8] sm:$0xff]   ;;  %v1278_v51 = vld [vmem:[%s1638_s3 + $0x140] sm:$0xff]  }
  0x16   :  { %v137_v0 = vadd.f32 %v136_v60, %v110_v52  ;;  %v219_v2 = vadd.f32 %v218_v62, %v192_v57  ;;  %1200 = vmatprep.subr.bf16.mxu1 %v1260_v32  ;;  %v1325_v52 = vmov 269488144   ;;  %v321_v57 = vsub.s32 1, %v1369_v7  ;;  %v313_v58 = vld [vmem:[%s1636_s1] sm:$0x3f] }
  0x17   :  { %v233_v53 = vunpack.c.l.s4 %v1325_v52  ;;  %v329_v60 = vsub.s32 3, %v1369_v7  ;;  %v1326_v62 = vmov 842150450   ;;  %v318_v16 = vrot.slane %v313_v58, %v317_v56 }
  0x18   :  { %v138_v3 = vadd.f32 %v137_v0, %v127_v59  ;;  %v220_v8 = vadd.f32 %v219_v2, %v193_v61  ;;  %1179 = vmatpush3.bf16.msra.mxu0 %v1259_v33  ;;  %v325_v59 = vsub.s32 2, %v1369_v7  ;;  %v1327_v2 = vmov 1414812756  }
  0x19   :  { %1201 = vmatpush3.bf16.msra.mxu1 %v1261_v34  ;;  %1180 = vmatprep.subr.bf16.mxu0 %v1262_v35  ;;  %v234_v61 = vunpack.c.0.s8 %v233_v53  ;;  %v322_v17 = vrot.slane %v313_v58, %v321_v57  ;;  %v330_v21 = vrot.slane %v313_v58, %v329_v60 }
  0x1a   :  { %v139_v9 = vadd.f32 %v138_v3, %v128_v63  ;;  %v221_v13 = vadd.f32 %v220_v8, %v210_v1  ;;  %1202 = vmatprep.subr.bf16.mxu1 %v1264_v36  ;;  %v240_v63 = vunpack.c.l.s4 %v1326_v62  ;;  %v409_v1 = vld [vmem:[%s1637_s2] sm:$0x3f]  ;;  %v247_v3 = vunpack.c.l.s4 %v1327_v2 }
  0x1b   :  { %v326_v20 = vrot.slane %v313_v58, %v325_v59  ;;  %v414_v22 = vrot.slane %v409_v1, %v317_v56  ;;  %v418_v23 = vrot.slane %v409_v1, %v321_v57  ;;  %v422_v28 = vrot.slane %v409_v1, %v325_v59 }
  0x1c   :  { %140 = vadd.xlane.f32.xlu0 %v139_v9  ;;  %v222_v14 = vadd.f32 %v221_v13, %v211_v4  ;;  %1181 = vmatpush3.bf16.msra.mxu0 %v1263_v37  ;;  %v1328_v4 = vmov 1987475062   ;;  %v333_v9 = vsub.s32 4, %v1369_v7  ;;  %v337_v13 = vsub.s32 5, %v1369_v7 }
  0x1d   :  { %1203 = vmatpush3.bf16.msra.mxu1 %v1265_v38  ;;  %1182 = vmatprep.subr.bf16.mxu0 %v1266_v39  ;;  %v254_v8 = vunpack.c.l.s4 %v1328_v4  ;;  %v241_v26 = vunpack.c.0.s8 %v240_v63  ;;  %v426_v29 = vrot.slane %v409_v1, %v329_v60  ;;  %v248_v34 = vunpack.c.0.s8 %v247_v3 }
  0x1e   :  { %1204 = vmatprep.subr.bf16.mxu1 %v1268_v40  ;;  %v334_v30 = vrot.slane %v313_v58, %v333_v9  ;;  %v338_v31 = vrot.slane %v313_v58, %v337_v13  ;;  %v430_v32 = vrot.slane %v409_v1, %v333_v9  ;;  %v434_v33 = vrot.slane %v409_v1, %v337_v13 }
  0x1f   :  { %v255_v35 = vunpack.c.0.s8 %v254_v8  ;;  %v339_v37 = vcombine.low %v318_v16, %v322_v17  ;;  %v340_v38 = vcombine.high %v318_v16, %v322_v17  ;;  %v341_v39 = vcombine.low %v326_v20, %v330_v21 }
  0x20   :  { %223 = vadd.xlane.f32.xlu0 %v222_v14  ;;  %1183 = vmatpush3.bf16.msra.mxu0 %v1267_v41  ;;  %v342_v40 = vcombine.high %v326_v20, %v330_v21  ;;  %v435_v41 = vcombine.low %v414_v22, %v418_v23 }
  0x21   :  { %1205 = vmatpush3.bf16.msra.mxu1 %v1269_v42  ;;  %1184 = vmatprep.subr.bf16.mxu0 %v1270_v43  ;;  %v436_v42 = vcombine.high %v414_v22, %v418_v23  ;;  %v437_v43 = vcombine.low %v422_v28, %v426_v29  ;;  %v258_v52 = vsub.s32 %v255_v35, %v1369_v7 }
  0x22   :  { %1206 = vmatprep.subr.bf16.mxu1 %v1272_v44  ;;  %v438_v44 = vcombine.high %v422_v28, %v426_v29  ;;  %v349_v53 = vrot.slane %v339_v37, %v1388_v19  ;;  %v363_v56 = vrot.slane %v341_v39, %v1388_v19  ;;  %v370_v57 = vrot.slane %v342_v40, %v1388_v19 }
  0x23   :  { %v445_v58 = vrot.slane %v435_v41, %v1388_v19  ;;  %v452_v59 = vrot.slane %v436_v42, %v1388_v19  ;;  %v459_v60 = vrot.slane %v437_v43, %v1388_v19 }
  0x24   :  { %1185 = vmatpush3.bf16.msra.mxu0 %v1271_v45  ;;  %v375_v45 = vcombine.low %v334_v30, %v338_v31  ;;  %v371_v8 = vcombine.low %v349_v53, %v363_v56  ;;  %v372_v9 = vcombine.high %v349_v53, %v363_v56 }
  0x25   :  { %1207 = vmatpush3.bf16.msra.mxu1 %v1273_v46  ;;  %1186 = vmatprep.subr.bf16.mxu0 %v1274_v47  ;;  %v376_v46 = vcombine.high %v334_v30, %v338_v31  ;;  %v471_v47 = vcombine.low %v430_v32, %v434_v33  ;;  %v468_v16 = vcombine.high %v445_v58, %v459_v60 }
  0x26   :  { %1208 = vmatprep.subr.bf16.mxu1 %v1276_v48  ;;  %v472_v48 = vcombine.high %v430_v32, %v434_v33  ;;  %v383_v62 = vrot.slane %v375_v45, %v1388_v19 }
  0x27   :  { %v479_v63 = vrot.slane %v471_v47, %v1388_v19 }
  0x28   :  { %1187 = vmatpush3.bf16.msra.mxu0 %v1275_v49  ;;  %v237_v49 = vsub.s32 %v234_v61, %v1369_v7  ;;  %v466_v61 = vrot.slane %v438_v44, %v1388_v19  ;;  %v391_v21 = vcombine.high %v383_v62, %v383_v62 }
  0x29   :  { %1209 = vmatpush3.bf16.msra.mxu1 %v1277_v50  ;;  %1216 = vmatprep.subr.bf16.mxu0 %v1278_v51  ;;  %v244_v50 = vsub.s32 %v241_v26, %v1369_v7  ;;  %v251_v51 = vsub.s32 %v248_v34, %v1369_v7  ;;  %v390_v7 = vrot.slane %v376_v46, %v1388_v19 }
  0x2a   :  { %v469_v17 = vcombine.low %v452_v59, %v466_v61  ;;  %v470_v20 = vcombine.high %v452_v59, %v466_v61  ;;  %v487_v23 = vcombine.high %v479_v63, %v479_v63 }
  0x2b   :  { %v392_v22 = vcombine.high %v390_v7, %v390_v7 }
  0xa9   :  { %v141_v54 = vpop.xlane.xlu0 %140 }
  0xaa   :  { %v1525_v55 = vmul.f32 0.0013020834, %v141_v54  ;;  %v356_v54 = vrot.slane %v340_v38, %v1388_v19 }
  0xac   :  { %v227_v14 = vmul.f32 %v1525_v55, %v1525_v55  ;;  %v238_v1 = vrot.slane %v1525_v55, %v237_v49  ;;  %v245_v2 = vrot.slane %v1525_v55, %v244_v50  ;;  %v252_v3 = vrot.slane %v1525_v55, %v251_v51 }
  0xad   :  { %v224_v0 = vpop.xlane.xlu0 %223  ;;  %v259_v4 = vrot.slane %v1525_v55, %v258_v52  ;;  %v373_v13 = vcombine.low %v356_v54, %v370_v57 }
  0xae   :  { %v226_v15 = vmul.f32 0.0013020834, %v224_v0  ;;  %v486_v0 = vrot.slane %v472_v48, %v1388_v19  ;;  %v264_v28 = vsub.f32 %v1396_v24, %v238_v1  ;;  %v266_v29 = vsub.f32 %v1371_v10, %v245_v2 }
  0xaf   :  { %v268_v30 = vsub.f32 %v1365_v5, %v252_v3  ;;  %v270_v55 = vsub.f32 %v1367_v6, %v259_v4  ;;  %v265_v35 = vsub.f32 %v1398_v25, %v238_v1  ;;  %v269_v37 = vsub.f32 %v1373_v11, %v252_v3 }
  0xb0   :  { %v228_v27 = vsub.f32 %v226_v15, %v227_v14  ;;  %v374_v14 = vcombine.high %v356_v54, %v370_v57  ;;  %v467_v15 = vcombine.low %v445_v58, %v459_v60  ;;  %v488_v26 = vcombine.high %v486_v0, %v486_v0 }
  0xb1   :  { %v271_v38 = vsub.f32 %v1375_v12, %v259_v4 }
  0xb2   :  { %v229_v36 = vadd.f32 1e-05, %v228_v27 }
  0xb4   :  { %1294 = vrsqrt.f32 %v229_v36  ;;  %v267_v36 = vsub.f32 %v1385_v18, %v245_v2 }
  0xbe   :  { %v1295_v27 = vpop.eup %1294 }
  0xbf   :  { %v279_v31 = vrot.slane %v1295_v27, %v237_v49  ;;  %v286_v32 = vrot.slane %v1295_v27, %v244_v50  ;;  %v293_v33 = vrot.slane %v1295_v27, %v251_v51  ;;  %v300_v34 = vrot.slane %v1295_v27, %v258_v52  ;;  %v1284_v27 = vld [vmem:[%s1638_s3 + $0x158] sm:$0xff]  }
  0xc1   :  { %v305_v39 = vmul.f32 %v279_v31, %v264_v28  ;;  %v307_v24 = vmul.f32 %v286_v32, %v266_v29  ;;  %v309_v40 = vmul.f32 %v293_v33, %v268_v30  ;;  %v311_v10 = vmul.f32 %v300_v34, %v270_v55  ;;  %v1285_v28 = vld [vmem:[%s1638_s3 + $0x118] sm:$0xff]   ;;  %v1286_v29 = vld [vmem:[%s1638_s3 + $0x160] sm:$0xff]   ;;  %v1288_v55 = vld [vmem:[%s1638_s3 + $0x168] sm:$0xff]  }
  0xc2   :  { %v306_v41 = vmul.f32 %v279_v31, %v265_v35  ;;  %v308_v5 = vmul.f32 %v286_v32, %v267_v36  ;;  %v310_v42 = vmul.f32 %v293_v33, %v269_v37  ;;  %v312_v6 = vmul.f32 %v300_v34, %v271_v38  ;;  %v1287_v30 = vld [vmem:[%s1638_s3 + $0x120] sm:$0xff]   ;;  %v1289_v31 = vld [vmem:[%s1638_s3 + $0x128] sm:$0xff]   ;;  %v1290_v32 = vld [vmem:[%s1638_s3 + $0x170] sm:$0xff]  }
  0xc3   :  { %v401_v43 = vmul.f32 %v371_v8, %v305_v39  ;;  %v403_v44 = vmul.f32 %v372_v9, %v307_v24  ;;  %v405_v45 = vmul.f32 %v373_v13, %v309_v40  ;;  %v407_v46 = vmul.f32 %v374_v14, %v311_v10  ;;  %v1291_v33 = vld [vmem:[%s1638_s3 + $0x130] sm:$0xff]   ;;  %v1292_v34 = vld [vmem:[%s1638_s3 + $0x178] sm:$0xff]   ;;  %v1123_v24 = vld [vmem:[%s1639_s4] ss:$0 sm:$0xff] }
  0xc4   :  { %v402_v47 = vmul.f32 %v383_v62, %v306_v41  ;;  %v404_v25 = vmul.f32 %v391_v21, %v308_v5  ;;  %v406_v48 = vmul.f32 %v390_v7, %v310_v42  ;;  %v408_v18 = vmul.f32 %v392_v22, %v312_v6  ;;  %v1280_v21 = vld [vmem:[%s1638_s3 + $0x148] sm:$0xff]   ;;  %v1293_v35 = vld [vmem:[%s1638_s3 + $0x138] sm:$0xff]  }
  0xc5   :  { %v497_v49 = vadd.f32 %v467_v15, %v401_v43  ;;  %v499_v11 = vadd.f32 %v468_v16, %v403_v44  ;;  %v501_v50 = vadd.f32 %v469_v17, %v405_v45  ;;  %v503_v12 = vadd.f32 %v470_v20, %v407_v46  ;;  %v1279_v20 = vld [vmem:[%s1638_s3 + $0x100] sm:$0xff]   ;;  %v1281_v22 = vld [vmem:[%s1638_s3 + $0x108] sm:$0xff]  }
  0xc6   :  { %v498_v51 = vadd.f32 %v479_v63, %v402_v47  ;;  %v500_v52 = vadd.f32 %v487_v23, %v404_v25  ;;  %v502_v53 = vadd.f32 %v486_v0, %v406_v48  ;;  %v504_v54 = vadd.f32 %v488_v26, %v408_v18  ;;  %v1282_v23 = vld [vmem:[%s1638_s3 + $0x150] sm:$0xff]  }
  0xc7   :  { %v513_v56 = vcombine.low %v497_v49, %v499_v11  ;;  %v515_v57 = vcombine.low %v501_v50, %v503_v12  ;;  %v514_v58 = vcombine.high %v497_v49, %v499_v11  ;;  %v516_v59 = vcombine.high %v501_v50, %v503_v12  ;;  %v1283_v26 = vld [vmem:[%s1638_s3 + $0x110] sm:$0xff]  }
  0xc8   :  { %v549_v60 = vcombine.low %v498_v51, %v500_v52  ;;  %v550_v61 = vcombine.low %v502_v53, %v504_v54 }
  0xc9   :  { %v523_v1 = vrot.slane %v513_v56, %v1388_v19  ;;  %v537_v62 = vrot.slane %v515_v57, %v1388_v19  ;;  %v530_v7 = vrot.slane %v514_v58, %v1388_v19  ;;  %v544_v2 = vrot.slane %v516_v59, %v1388_v19 }
  0xca   :  { %v557_v3 = vrot.slane %v549_v60, %v1388_v19  ;;  %v564_v63 = vrot.slane %v550_v61, %v1388_v19 }
  0xcb   :  { %v546_v0 = vcombine.high %v523_v1, %v537_v62  ;;  %v548_v4 = vcombine.high %v530_v7, %v544_v2  ;;  %v545_v8 = vcombine.low %v523_v1, %v537_v62  ;;  %v547_v9 = vcombine.low %v530_v7, %v544_v2 }
  0xcc   :  { %v566_v13 = vcombine.high %v557_v3, %v564_v63  ;;  %v565_v36 = vcombine.low %v557_v3, %v564_v63 }
  0xcd   :  { %v574_v14 = vpack.c.bf16 %v546_v0, %v546_v0  ;;  %v576_v15 = vpack.c.bf16 %v548_v4, %v548_v4  ;;  %v573_v16 = vpack.c.bf16 %v545_v8, %v545_v8  ;;  %v575_v17 = vpack.c.bf16 %v547_v9, %v547_v9 }
  0xce   :  { %v578_v19 = vpack.c.bf16 %v566_v13, %v566_v13  ;;  %v577_v37 = vpack.c.bf16 %v565_v36, %v565_v36 }
  0xcf   :  { %1002 = vmatprep.mubr.bf16.mxu0 %v574_v14  ;;  %1042 = vmatprep.mubr.bf16.mxu1 %v576_v15 }
  0xd0   :  { %1003 = vmatmul.mubr.bf16.vlgmr.msra.gmra.mrb[0].mxu0 %v573_v16  ;;  %1043 = vmatmul.mubr.bf16.vlgmr.msra.gmra.mrb[0].mxu1 %v575_v17 }
  0xd1   :  { %1217 = vmatpush3.bf16.msra.mxu0 %v1279_v20  ;;  %1082 = vmatprep.mubr.bf16.mxu0 %v578_v19 }
  0xd2   :  { %1218 = vmatprep.subr.bf16.mxu0 %v1280_v21 }
  0xd5   :  { %1219 = vmatpush3.bf16.msra.mxu0 %v1281_v22 }
  0xd6   :  { %1220 = vmatprep.subr.bf16.mxu0 %v1282_v23 }
  0xd9   :  { %1221 = vmatpush3.bf16.msra.mxu0 %v1283_v26 }
  0xda   :  { %1222 = vmatprep.subr.bf16.mxu0 %v1284_v27 }
  0xdd   :  { %1223 = vmatpush3.bf16.msra.mxu0 %v1285_v28 }
  0xde   :  { %1224 = vmatprep.subr.bf16.mxu0 %v1286_v29 }
  0xe1   :  { %1225 = vmatpush3.bf16.msra.mxu0 %v1287_v30 }
  0xe2   :  { %1226 = vmatprep.subr.bf16.mxu0 %v1288_v55 }
  0xe5   :  { %1227 = vmatpush3.bf16.msra.mxu0 %v1289_v31 }
  0xe6   :  { %1228 = vmatprep.subr.bf16.mxu0 %v1290_v32 }
  0xe9   :  { %1229 = vmatpush3.bf16.msra.mxu0 %v1291_v33 }
  0xea   :  { %1230 = vmatprep.subr.bf16.mxu0 %v1292_v34 }
  0xed   :  { %1231 = vmatpush3.bf16.msra.mxu0 %v1293_v35 }
  0xf0   :  { %1083 = vmatmul.mubr.bf16.vlgmr.msra.gmra.mrb[4].mxu0 %v577_v37 }
 0x1a3   :  { %v1188_v38 = vpop.f32.mrb[0].mxu0  ;;  %v1210_v39 = vpop.f32.mrb[0].mxu1 }
 0x1a4   :  { %v1189_v40 = vpop.f32.mrb[1].mxu0  ;;  %v1211_v10 = vpop.f32.mrb[1].mxu1 }
 0x1a5   :  { %v1190_v41 = vadd.f32 %v1189_v40, %v1188_v38  ;;  %v1212_v5 = vadd.f32 %v1211_v10, %v1210_v39  ;;  %v1191_v42 = vpop.f32.mrb[2].mxu0  ;;  %v1213_v6 = vpop.f32.mrb[2].mxu1 }
 0x1a6   :  { %v1192_v43 = vpop.f32.mrb[3].mxu0  ;;  %v1214_v44 = vpop.f32.mrb[3].mxu1 }
 0x1a7   :  { %v1005_v45 = vadd.f32 %v1190_v41, %v1123_v24 }
 0x1a9   :  { %v1045_v46 = vadd.f32 %v1212_v5, %v1005_v45 }
 0x1c3   :  { %v1232_v47 = vpop.f32.mrb[4].mxu0 }
 0x1c4   :  { %v1233_v25 = vpop.f32.mrb[5].mxu0 }
 0x1c5   :  { %v1234_v48 = vadd.f32 %v1233_v25, %v1232_v47  ;;  %v1235_v18 = vpop.f32.mrb[6].mxu0 }
 0x1c6   :  { %v1236_v49 = vpop.f32.mrb[7].mxu0 }
 0x1c7   :  { %v1085_v11 = vadd.f32 %v1234_v48, %v1045_v46 }
 0x1c9   :  { %v1091_v50 = vsel %vm1090_vm0, %v1085_v11, -inf }
 0x1ca   :  { %1092 = vmax.xlane.f32.xlu1 %v1091_v50 }
 0x257   :  { %v1093_v12 = vpop.xlane.xlu1 %1092 }
 0x258   :  { %v1094_v51 = vsub.f32 %v1085_v11, %v1093_v12 }
 0x25a   :  { %v1095_v52 = vmul.f32 1.442695, %v1094_v51 }
 0x25c   :  { %1296 = vpow2.f32 %v1095_v52 }
 0x266   :  { %v1297_v53 = vpop.eup %1296 }
 0x267   :  { %v1097_v54 = vsel %vm1090_vm0, %v1297_v53, 0.0 }
 0x268   :  { %1098 = vadd.xlane.f32.xlu1 %v1097_v54 }
 0x2f5   :  { %v1099_v56 = vpop.xlane.xlu1 %1098 }
 0x2f6   :  { %1298 = vrcp.f32 %v1099_v56 }
 0x300   :  { %v1299_v57 = vpop.eup %1298 }
 0x301   :  { %v1101_v58 = vmul.f32 %v1299_v57, %v1297_v53 }
 0x303   :  { %1102 = vst.msk [vmem:[#allocation3] sm:$0xff] %vm1090_vm0, %v1101_v58 }
 0x304   :  { %1107 = vsyncadd [#allocation4], 96  ;;  %s1329_s3 = smov [#allocation3]  }
 0x305   :  { %s1108_s4 = sshll.u32 %s1329_s3, 4  ;;  %s1109_s4 = int_to_ptr.vmem [resolvable:$true] %s1108_s4 }
 0x306   :  { %s1300_s14 = scalar_lea.vmem %s1109_s4, 32  ;;  %s1304_s15 = scalar_lea.vmem %s1109_s4, 128 }
 0x307   :  { %p1301_p0 = scmp.ne.s32.totalorder %s1109_s4, %s1300_s14  ;;  %p1305_p1 = scmp.lt.s32.totalorder %s1109_s4, %s1109_s4 }
 0x308   :  { %p1306_p2 = scmp.lt.s32.totalorder %s1304_s15, %s1300_s14 }
 0x30a   :  { %p1307_p3 = por %p1306_p2, %p1305_p1 }
 0x30c   :  { %p1308_p4 = pnand %p1307_p3, %p1301_p0 }
 0x30e   :  { %1311 = shalt.err (!%p1308_p4)
}
 0x30f   :  { %s1312_s18 = scalar_lea.hbm %s1640_s5, 32 }
 0x310   :  { %p1313_p5 = scmp.ne.s32.totalorder %s1640_s5, %s1312_s18  ;;  %p1316_p6 = scmp.lt.u32.totalorder %s1312_s18, %s1640_s5 }
 0x312   :  { %p1318_p7 = pnand %p1316_p6, %p1313_p5 }
 0x314   :  { %1321 = shalt.err (!%p1318_p7)
}
 0x315   :  { %s1330_s22 = smov 32   ;;  %s1331_s23 = smov 2  }
 0x316   :  { %1114 = dma.vmem_to_hbm [thread:$0]  %s1109_s4, 32, %s1640_s5, [#allocation4], %s1330_s22, %s1330_s22, %s1331_s23  }
 0x317   :  { %1322 = dma.done.wait [#allocation4], 128  }
 0x318   :  { %1323 = vsyncadd [#allocation4], 4294967168 }
 0x319   :  { %1118 = vsyncpa [#allocation4], 1 }

</bundles_post_ra>
